<compile_context>
chip_gen: v5e
topology: v5e:2x2
jax: 0.10.0
libtpu: 0.0.40
codegen_flags: <defaults>
</compile_context>

<pallas_src>
import functools

import jax
import jax.numpy as jnp
from jax.experimental import pallas as pl
from jax.experimental.pallas import tpu as pltpu


def _info_bonus_kernel(beta_ref, choices_ref, lt_ref, out_ref):
    # choices_ref: (tile_n, T) int32   VMEM
    # lt_ref:      (T, T)      bf16    VMEM (strict lower-tri, resident)
    # beta_ref:    (1,)        f32     SMEM
    # out_ref:     (A, tile_n, T) f32  VMEM (A-major, lane-dense in T)
    tile_n, T = choices_ref.shape
    A = out_ref.shape[0]

    ch = choices_ref[...]  # (tile_n, T) int32

    # One-hot built directly in the A-major layout: onehot[a, n, t] = (ch[n,t]==a)
    a_iota = jax.lax.broadcasted_iota(jnp.int32, (A, tile_n, T), 0)
    onehot = (ch[None, :, :] == a_iota).astype(jnp.bfloat16)      # (A, tile_n, T)
    onehot2d = onehot.reshape(A * tile_n, T)                      # (A*tile_n, T)

    # Exclusive prefix count via one dense MXU matmul (f32 accumulation, exact):
    #   cum[r, t] = sum_{s < t} onehot2d[r, s]
    cum = jnp.dot(onehot2d, lt_ref[...], preferred_element_type=jnp.float32)

    beta = beta_ref[0]
    out_ref[...] = (cum * beta).reshape(A, tile_n, T)


def _choose_tile_n(N, T, A):
    # Target ~2 MiB f32 output block per grid step (double-buffered it stays
    # comfortably under the 16 MiB v5e scoped-VMEM default).
    target_bytes = 2 << 20
    per_row = A * T * 4
    t = max(1, target_bytes // per_row)
    if t >= N:
        return N
    return max(8, (t // 8) * 8)  # sublane-friendly tile when blocking N


def _vmem_limit_bytes(tile_n, T, A):
    choices_blk = tile_n * T * 4
    lt_blk = T * T * 2
    out_blk = A * tile_n * T * 4
    intermediates = A * tile_n * T * (2 + 4)   # bf16 one-hot + f32 cum
    est = 2 * (choices_blk + lt_blk + out_blk) + intermediates
    return int(min(max(2 * est, 4 << 20), 48 << 20))


@functools.partial(jax.jit, static_argnames=("num_options",))
def information_bonus(choices, beta, num_options):
    """choices: (N, T) int32; beta: scalar f32. Returns (N, T, num_options) f32."""
    N, T = choices.shape
    A = num_options

    tile_n = _choose_tile_n(N, T, A)
    n_blocks = pl.cdiv(N, tile_n)
    N_pad = n_blocks * tile_n
    if N_pad != N:
        choices = jnp.pad(choices, ((0, N_pad - N), (0, 0)))

    beta_arr = jnp.asarray(beta, jnp.float32).reshape(1)

    # Strict lower-triangular LT[s, t] = 1 iff s < t (exact 0/1 in bf16).
    s_idx = jax.lax.broadcasted_iota(jnp.int32, (T, T), 0)
    t_idx = jax.lax.broadcasted_iota(jnp.int32, (T, T), 1)
    lt = (s_idx < t_idx).astype(jnp.bfloat16)

    out_ant = pl.pallas_call(
        _info_bonus_kernel,
        out_shape=jax.ShapeDtypeStruct((A, N_pad, T), jnp.float32),
        grid=(n_blocks,),
        in_specs=[
            pl.BlockSpec(memory_space=pltpu.MemorySpace.SMEM),       # beta
            pl.BlockSpec((tile_n, T), lambda i: (i, 0)),             # choices
            pl.BlockSpec((T, T), lambda i: (0, 0)),                  # LT (resident)
        ],
        out_specs=pl.BlockSpec((A, tile_n, T), lambda i: (0, i, 0)),
        compiler_params=pltpu.CompilerParams(
            dimension_semantics=("parallel",),
            vmem_limit_bytes=_vmem_limit_bytes(tile_n, T, A),
        ),
    )(beta_arr, choices, lt)

    # (A, N_pad, T) -> (N, T, A): cheap layout plumbing in the wrapper so the
    # kernel stores lane-dense blocks.
    return jnp.transpose(out_ant[:, :N, :], (1, 2, 0))


def _reference(choices, beta, num_options):
    """Pure-JAX port of the PyTorch forward, for verification."""
    N, T = choices.shape
    onehot = (choices[:, :-1, None]
              == jnp.arange(num_options)[None, None, :]).astype(jnp.float32)
    cum1 = jnp.cumsum(onehot, axis=1)                     # (N, T-1, A)
    cum0 = jnp.zeros((N, 1, num_options), jnp.float32)    # (N, 1, A)
    return jnp.concatenate([cum0, cum1], axis=1) * beta


if __name__ == "__main__":
    num_options = 4
    N, T = 2, 8

    key = jax.random.PRNGKey(0)
    k_choices, k_beta = jax.random.split(key)

    # Deterministic synthetic inputs / parameter (beta = 0.01 * randn([])).
    choices = jax.random.randint(k_choices, (N, T), 0, num_options,
                                 dtype=jnp.int32)
    beta = 0.01 * jax.random.normal(k_beta, (), dtype=jnp.float32)

    out = information_bonus(choices, beta, num_options)
    out = jax.block_until_ready(out)

    ref = _reference(choices, beta, num_options)
    assert out.shape == (N, T, num_options)
    assert out.dtype == jnp.float32
    assert jnp.allclose(out, ref, atol=1e-6), "Pallas kernel mismatch vs reference"

    print("KERNEL_OK")
</pallas_src>

<mosaic_0001>
module attributes {stable_mosaic.version = 11 : i64} {
  func.func @_info_bonus_kernel(%arg0: i32, %arg1: memref<1xf32, #tpu.memory_space<smem>>, %arg2: memref<2x8xi32, #tpu.memory_space<vmem>>, %arg3: memref<8x8xbf16, #tpu.memory_space<vmem>>, %arg4: memref<4x2x8xf32, #tpu.memory_space<vmem>>) attributes {dimension_semantics = [#tpu.dimension_semantics<parallel>], iteration_bounds = array<i64: 1>, scalar_prefetch = 0 : i64, scratch_operands = 0 : i64, tpu.core_type = #tpu.core_type<tc>, window_params = [{transform_indices = @transform_0, window_bounds = array<i64: 1>}, {transform_indices = @transform_1, window_bounds = array<i64: 2, 8>}, {pipeline_mode = #tpu.pipeline_mode<synchronous>, transform_indices = @transform_2, window_bounds = array<i64: 8, 8>}, {transform_indices = @transform_3, window_bounds = array<i64: 4, 2, 8>}]} {
    %c0 = arith.constant 0 : index
    %c0_0 = arith.constant 0 : index
    %0 = vector.load %arg2[%c0, %c0_0] : memref<2x8xi32, #tpu.memory_space<vmem>>, vector<2x8xi32>
    %1 = tpu.iota {dimensions = array<i32: 0>} : vector<4x2x8xi32>
    %2 = vector.shape_cast %0 : vector<2x8xi32> to vector<1x2x8xi32>
    %3 = vector.broadcast %2 : vector<1x2x8xi32> to vector<4x2x8xi32>
    %4 = arith.cmpi eq, %3, %1 : vector<4x2x8xi32>
    %5 = arith.extui %4 : vector<4x2x8xi1> to vector<4x2x8xi32>
    %6 = arith.sitofp %5 : vector<4x2x8xi32> to vector<4x2x8xf32>
    %7 = arith.truncf %6 : vector<4x2x8xf32> to vector<4x2x8xbf16>
    %8 = vector.shape_cast %7 : vector<4x2x8xbf16> to vector<8x8xbf16>
    %c0_1 = arith.constant 0 : index
    %c0_2 = arith.constant 0 : index
    %9 = vector.load %arg3[%c0_1, %c0_2] : memref<8x8xbf16, #tpu.memory_space<vmem>>, vector<8x8xbf16>
    %cst = arith.constant dense<0.000000e+00> : vector<8x8xf32>
    %10 = tpu.matmul %8, %9, %cst {dimension_numbers = #tpu.dot_dimension_numbers<[1], [0], [0], [1], [0, 0, 1, 1], [], []>} : vector<8x8xbf16>, vector<8x8xbf16>, vector<8x8xf32> -> vector<8x8xf32>
    %c0_3 = arith.constant 0 : index
    %11 = memref.load %arg1[%c0_3] : memref<1xf32, #tpu.memory_space<smem>>
    %12 = vector.broadcast %11 : f32 to vector<8x8xf32>
    %13 = arith.mulf %10, %12 : vector<8x8xf32>
    %14 = vector.shape_cast %13 : vector<8x8xf32> to vector<4x2x8xf32>
    %c0_4 = arith.constant 0 : index
    %c0_5 = arith.constant 0 : index
    %c0_6 = arith.constant 0 : index
    %15 = vector.load %arg4[%c0_4, %c0_5, %c0_6] : memref<4x2x8xf32, #tpu.memory_space<vmem>>, vector<4x2x8xf32>
    tpu.vector_store %arg4[%c0_4, %c0_5, %c0_6], %14 {strides = array<i32>} : memref<4x2x8xf32, #tpu.memory_space<vmem>>, vector<4x2x8xf32>,
    return
  }
  func.func @transform_0(%arg0: i32) -> i32 {
    %c0_i32 = arith.constant 0 : i32
    %c0_i32_0 = arith.constant 0 : i32
    return %c0_i32 : i32
  }
  func.func @transform_1(%arg0: i32) -> (i32, i32) {
    %c0_i32 = arith.constant 0 : i32
    %c0_i32_0 = arith.constant 0 : i32
    return %arg0, %c0_i32 : i32, i32
  }
  func.func @transform_2(%arg0: i32) -> (i32, i32) {
    %c0_i32 = arith.constant 0 : i32
    %c0_i32_0 = arith.constant 0 : i32
    %c0_i32_1 = arith.constant 0 : i32
    return %c0_i32, %c0_i32_0 : i32, i32
  }
  func.func @transform_3(%arg0: i32) -> (i32, i32, i32) {
    %c0_i32 = arith.constant 0 : i32
    %c0_i32_0 = arith.constant 0 : i32
    %c0_i32_1 = arith.constant 0 : i32
    return %c0_i32, %arg0, %c0_i32_0 : i32, i32, i32
  }
}

</mosaic_0001>

<bundles_post_ra>
// kernel: information_bonus.1
= control target key start
LH: loop header
LB: loop body
LE: loop exit
PB: predicated region body
PF: predicated region fallthrough
CT: control target
= control target key end

     0   :  { %vm49_vm0 = vcmask 1043456   ;;  %v91_v3 = vmov 0.0   ;;  %vm46_vm5 = vcmask 64512   ;;  %vm76_vm6 = vcmask 58368   ;;  %s133_s2 = inlined_call_operand.vmem [shape: bf16[8,8], index: 2, kind: input, shape index: {}]   ;;  %s134_s1 = inlined_call_operand.vmem [shape: s32[2,8], index: 1, kind: input, shape index: {}]   ;;  %s135_s0 = inlined_call_operand.<no memory space> [shape: f32[1], index: 0, kind: input, shape index: {}]   ;;  %s136_s3 = inlined_call_operand.vmem [shape: f32[4,2,8], index: 3, kind: output, shape index: {}]  }
   0x1   :  { %v33_v0 = vld [vmem:[%s133_s2] sm:$0xf]  ;;  %v67_v13 = vstv %s135_s0 }
   0x2   :  { %v16_v1 = vld [vmem:[%s134_s1] sm:$0x3]  ;;  %v51_v2 = vsel %vm49_vm0, %v33_v0, 0 }
   0x3   :  { %vm17_vm1 = vcmp.eq.s32.totalorder %v16_v1, 0  ;;  %vm18_vm2 = vcmp.eq.s32.totalorder %v16_v1, 1  ;;  %vm19_vm3 = vcmp.eq.s32.totalorder %v16_v1, 2  ;;  %60 = vmatpush.bf16.msra.mxu0 %v51_v2  ;;  %vm20_vm4 = vcmp.eq.s32.totalorder %v16_v1, 3 }
   0x4   :  { %v85_v4 = vsel %vm17_vm1, 1.0, %v91_v3  ;;  %v86_v5 = vsel %vm18_vm2, 1.0, %v91_v3  ;;  %v87_v6 = vsel %vm19_vm3, 1.0, %v91_v3  ;;  %v88_v7 = vsel %vm20_vm4, 1.0, %v91_v3 }
   0x5   :  { %v29_v8 = vpack.c.bf16 %v85_v4, %v85_v4  ;;  %v30_v9 = vpack.c.bf16 %v86_v5, %v86_v5  ;;  %v31_v10 = vpack.c.bf16 %v87_v6, %v87_v6  ;;  %v32_v11 = vpack.c.bf16 %v88_v7, %v88_v7 }
   0x7   :  { %35 = vst [vmem:[#allocation1] ss:$9 sm:$0xff] %v29_v8 }
   0x8   :  { %38 = vst [vmem:[#allocation1 + $0x1] ss:$9 sm:$0xff] %v30_v9 }
   0x9   :  { %41 = vst [vmem:[#allocation1 + $0x2] ss:$9 sm:$0xff] %v31_v10 }
   0xa   :  { %44 = vst [vmem:[#allocation1 + $0x3] ss:$9 sm:$0xff] %v32_v11 }
  0x11   :  { %v45_v12 = vld [vmem:[#allocation1] sm:$0xff] }
  0x12   :  { %89 = vmatmul.msk.bf16.vlgmr.msra.gmra.mxu0 %vm46_vm5, %v45_v12 }
  0x8f   :  { %v62_v14 = vpop.f32.mrf.mxu0 }
  0x90   :  { %v68_v15 = vmul.f32 %v67_v13, %v62_v14 }
  0x92   :  { %v70_v16 = vrot.slane %v68_v15, 2  ;;  %v71_v17 = vrot.slane %v68_v15, 4  ;;  %v72_v18 = vrot.slane %v68_v15, 6  ;;  %77 = vst.msk [vmem:[%s136_s3] sm:$0x3] %vm76_vm6, %v68_v15 }
  0x94   :  { %78 = vst.msk [vmem:[%s136_s3 + $0x2] sm:$0x3] %vm76_vm6, %v70_v16 }
  0x95   :  { %79 = vst.msk [vmem:[%s136_s3 + $0x4] sm:$0x3] %vm76_vm6, %v71_v17 }
  0x96   :  { %80 = vst.msk [vmem:[%s136_s3 + $0x6] sm:$0x3] %vm76_vm6, %v72_v18 }
  0x97   :  { %v64_v19 = vpop.f32.mrf.mxu0 }

</bundles_post_ra>
